<compile_context>
chip_gen: v7x
topology: tpu7x:2x2x1
jax: 0.10.0
libtpu: 0.0.40
codegen_flags: <defaults>
</compile_context>

<pallas_src>
import math

import jax
import jax.numpy as jnp
from jax.experimental import pallas as pl
from jax.experimental.pallas import tpu as pltpu


def _erf_f32(x):
    """Elementwise erf via Abramowitz & Stegun 7.1.26 (max abs err ~1.5e-7).

    Uses only mul/add/exp/select so it lowers on every TPU generation without
    relying on an erf primitive lowering in Mosaic.
    """
    p = 0.3275911
    a1, a2, a3, a4, a5 = (0.254829592, -0.284496736, 1.421413741,
                          -1.453152027, 1.061405429)
    ax = jnp.abs(x)
    t = 1.0 / (1.0 + p * ax)
    poly = t * (a1 + t * (a2 + t * (a3 + t * (a4 + t * a5))))
    y = 1.0 - poly * jnp.exp(-ax * ax)
    return jnp.where(x >= 0, y, -y)


def _gelu_exact(x):
    # nn.GELU() default (erf form), not the tanh approximation.
    return 0.5 * x * (1.0 + _erf_f32(x * 0.7071067811865476))


def _mlp_kernel(x_ref, w1_ref, b1_ref, w2_ref, b2_ref, o_ref):
    """One row-tile of the fused MLP.

    x_ref : (tm, D_in)      input rows (model dtype)
    w1_ref: (D_in, D_hid)   fc1 weight, transposed (model dtype)
    b1_ref: (1, D_hid)      fc1 bias (f32, pre-cast in the wrapper)
    w2_ref: (D_hid, D_out)  fc2 weight, transposed (model dtype)
    b2_ref: (1, D_out)      fc2 bias (f32, pre-cast in the wrapper)
    o_ref : (tm, D_out)     output rows (model dtype)
    """
    # fc1: MXU matmul in the model dtype, f32 accumulation.
    h = jnp.dot(x_ref[...], w1_ref[...], preferred_element_type=jnp.float32)
    h = h + b1_ref[...]
    h = _gelu_exact(h)
    # fc2: cast the activation back to the weight dtype so bf16 models feed
    # bf16 MXU operands (no-op for f32).
    h = h.astype(w2_ref.dtype)
    y = jnp.dot(h, w2_ref[...], preferred_element_type=jnp.float32)
    y = y + b2_ref[...]
    o_ref[...] = y.astype(o_ref.dtype)


def _round_up(n, m):
    return ((n + m - 1) // m) * m


def _pick_tm(m_rows, d_in, d_hid, d_out, dtype_bytes,
             vmem_budget_bytes=40 * 1024 * 1024):
    """Largest row tile whose working set fits a conservative VMEM budget
    (safe on v7x's 64 MiB as well as v5e/v6e's 128 MiB)."""
    # Constant operands (weights + biases); assume worst-case double buffering.
    const_bytes = (2 * (d_in * d_hid + d_hid * d_out) * dtype_bytes
                   + 2 * (d_hid + d_out) * 4)
    tm = 8
    for cand in (1024, 512, 256, 128, 64, 32, 16, 8):
        tile_bytes = 2 * cand * (d_in + d_out) * dtype_bytes   # dbl-buffered I/O
        interm_bytes = cand * d_hid * 4                        # f32 activations
        if const_bytes + tile_bytes + interm_bytes <= vmem_budget_bytes:
            tm = cand
            break
    # Never tile wider than the (8-aligned) row count.
    return min(tm, _round_up(m_rows, 8))


def mlp_forward(x, fc1_weight, fc1_bias, fc2_weight, fc2_bias):
    """Replicates Mlp.forward (drop=0.0).

    Args:
      x:          (..., D_in) input.
      fc1_weight: (D_hid, D_in)  nn.Linear convention.
      fc1_bias:   (D_hid,)
      fc2_weight: (D_out, D_hid)
      fc2_bias:   (D_out,)
    Returns:
      (..., D_out)
    """
    *lead, d_in = x.shape
    d_hid = fc1_weight.shape[0]
    d_out = fc2_weight.shape[0]
    m_rows = math.prod(lead) if lead else 1

    x2d = x.reshape(m_rows, d_in)
    w1_t = fc1_weight.T                      # (D_in, D_hid): y = x @ W^T
    w2_t = fc2_weight.T                      # (D_hid, D_out)
    b1_2d = fc1_bias.reshape(1, d_hid).astype(jnp.float32)   # cast once, not per tile
    b2_2d = fc2_bias.reshape(1, d_out).astype(jnp.float32)

    dtype_bytes = jnp.dtype(x.dtype).itemsize
    tm = _pick_tm(m_rows, d_in, d_hid, d_out, dtype_bytes)

    # cdiv grid with a zero-padded tail (padded rows are sliced off below).
    m_pad = _round_up(m_rows, tm)
    if m_pad != m_rows:
        x2d = jnp.pad(x2d, ((0, m_pad - m_rows), (0, 0)))
    grid = (m_pad // tm,)

    vmem_est = (2 * (d_in * d_hid + d_hid * d_out) * dtype_bytes
                + 2 * tm * (d_in + d_out) * dtype_bytes
                + tm * d_hid * 4
                + 2 * (d_hid + d_out) * 4)
    vmem_limit = int(min(48 * 1024 * 1024, max(32 * 1024 * 1024, 2 * vmem_est)))

    out2d = pl.pallas_call(
        _mlp_kernel,
        out_shape=jax.ShapeDtypeStruct((m_pad, d_out), x.dtype),
        grid_spec=pltpu.PrefetchScalarGridSpec(
            num_scalar_prefetch=0,
            grid=grid,
            in_specs=[
                pl.BlockSpec((tm, d_in), lambda i: (i, 0)),
                pl.BlockSpec((d_in, d_hid), lambda i: (0, 0)),
                pl.BlockSpec((1, d_hid), lambda i: (0, 0)),
                pl.BlockSpec((d_hid, d_out), lambda i: (0, 0)),
                pl.BlockSpec((1, d_out), lambda i: (0, 0)),
            ],
            out_specs=pl.BlockSpec((tm, d_out), lambda i: (i, 0)),
        ),
        compiler_params=pltpu.CompilerParams(
            dimension_semantics=("parallel",),   # row tiles shard across TCs
            vmem_limit_bytes=vmem_limit,
        ),
    )(x2d, w1_t, b1_2d, w2_t, b2_2d)

    out2d = out2d[:m_rows]
    return out2d.reshape(*lead, d_out)


def _reference_forward(x, fc1_weight, fc1_bias, fc2_weight, fc2_bias):
    """Pure-JAX reference for correctness check."""
    hp = jax.lax.Precision.HIGHEST
    h = jnp.einsum("...i,hi->...h", x, fc1_weight, precision=hp) + fc1_bias
    h = jax.nn.gelu(h, approximate=False)
    return jnp.einsum("...h,oh->...o", h, fc2_weight, precision=hp) + fc2_bias


if __name__ == "__main__":
    # Small shapes consistent with the module: tokens (B=2, N=64), 32 -> 128 -> 32.
    B, N, D_IN, D_HID, D_OUT = 2, 64, 32, 128, 32
    key = jax.random.PRNGKey(0)
    kx, k1w, k1b, k2w, k2b = jax.random.split(key, 5)

    x = jax.random.normal(kx, (B, N, D_IN), dtype=jnp.float32)
    fc1_w = jax.random.normal(k1w, (D_HID, D_IN), dtype=jnp.float32) / jnp.sqrt(float(D_IN))
    fc1_b = 0.1 * jax.random.normal(k1b, (D_HID,), dtype=jnp.float32)
    fc2_w = jax.random.normal(k2w, (D_OUT, D_HID), dtype=jnp.float32) / jnp.sqrt(float(D_HID))
    fc2_b = 0.1 * jax.random.normal(k2b, (D_OUT,), dtype=jnp.float32)

    out = mlp_forward(x, fc1_w, fc1_b, fc2_w, fc2_b)
    out = jax.block_until_ready(out)

    ref = _reference_forward(x, fc1_w, fc1_b, fc2_w, fc2_b)
    assert out.shape == (B, N, D_OUT), out.shape
    max_err = float(jnp.max(jnp.abs(out - ref)))
    assert jnp.allclose(out, ref, atol=2e-4, rtol=2e-4), max_err

    print("KERNEL_OK")
</pallas_src>

<mosaic_0001>
module attributes {stable_mosaic.version = 11 : i64} {
  func.func @_mlp_kernel(%arg0: i32, %arg1: memref<128x32xf32, #tpu.memory_space<vmem>>, %arg2: memref<32x128xf32, #tpu.memory_space<vmem>>, %arg3: memref<1x128xf32, #tpu.memory_space<vmem>>, %arg4: memref<128x32xf32, #tpu.memory_space<vmem>>, %arg5: memref<1x32xf32, #tpu.memory_space<vmem>>, %arg6: memref<128x32xf32, #tpu.memory_space<vmem>>) attributes {dimension_semantics = [#tpu.dimension_semantics<parallel>], iteration_bounds = array<i64: 1>, scalar_prefetch = 0 : i64, scratch_operands = 0 : i64, tpu.core_type = #tpu.core_type<tc>, window_params = [{transform_indices = @transform_0, window_bounds = array<i64: 128, 32>}, {pipeline_mode = #tpu.pipeline_mode<synchronous>, transform_indices = @transform_1, window_bounds = array<i64: 32, 128>}, {pipeline_mode = #tpu.pipeline_mode<synchronous>, transform_indices = @transform_2, window_bounds = array<i64: 1, 128>}, {pipeline_mode = #tpu.pipeline_mode<synchronous>, transform_indices = @transform_3, window_bounds = array<i64: 128, 32>}, {pipeline_mode = #tpu.pipeline_mode<synchronous>, transform_indices = @transform_4, window_bounds = array<i64: 1, 32>}, {transform_indices = @transform_5, window_bounds = array<i64: 128, 32>}]} {
    %c0 = arith.constant 0 : index
    %c0_0 = arith.constant 0 : index
    %0 = vector.load %arg1[%c0, %c0_0] : memref<128x32xf32, #tpu.memory_space<vmem>>, vector<128x32xf32>
    %c0_1 = arith.constant 0 : index
    %c0_2 = arith.constant 0 : index
    %1 = vector.load %arg2[%c0_1, %c0_2] : memref<32x128xf32, #tpu.memory_space<vmem>>, vector<32x128xf32>
    %cst = arith.constant dense<0.000000e+00> : vector<128x128xf32>
    %2 = tpu.matmul %0, %1, %cst {dimension_numbers = #tpu.dot_dimension_numbers<[1], [0], [0], [1], [0, 0, 1, 1], [], []>} : vector<128x32xf32>, vector<32x128xf32>, vector<128x128xf32> -> vector<128x128xf32>
    %c0_3 = arith.constant 0 : index
    %c0_4 = arith.constant 0 : index
    %3 = vector.load %arg3[%c0_3, %c0_4] : memref<1x128xf32, #tpu.memory_space<vmem>>, vector<1x128xf32>
    %4 = vector.broadcast %3 : vector<1x128xf32> to vector<128x128xf32>
    %5 = arith.addf %2, %4 : vector<128x128xf32>
    %cst_5 = arith.constant 5.000000e-01 : f32
    %6 = vector.broadcast %cst_5 : f32 to vector<128x128xf32>
    %7 = arith.mulf %6, %5 : vector<128x128xf32>
    %cst_6 = arith.constant 0.707106769 : f32
    %8 = vector.broadcast %cst_6 : f32 to vector<128x128xf32>
    %9 = arith.mulf %5, %8 : vector<128x128xf32>
    %10 = math.absf %9 : vector<128x128xf32>
    %cst_7 = arith.constant 0.327591091 : f32
    %11 = vector.broadcast %cst_7 : f32 to vector<128x128xf32>
    %12 = arith.mulf %11, %10 : vector<128x128xf32>
    %cst_8 = arith.constant 1.000000e+00 : f32
    %13 = vector.broadcast %cst_8 : f32 to vector<128x128xf32>
    %14 = arith.addf %13, %12 : vector<128x128xf32>
    %cst_9 = arith.constant 1.000000e+00 : f32
    %15 = vector.broadcast %cst_9 : f32 to vector<128x128xf32>
    %16 = arith.divf %15, %14 : vector<128x128xf32>
    %cst_10 = arith.constant 1.06140542 : f32
    %17 = vector.broadcast %cst_10 : f32 to vector<128x128xf32>
    %18 = arith.mulf %16, %17 : vector<128x128xf32>
    %cst_11 = arith.constant -1.45315206 : f32
    %19 = vector.broadcast %cst_11 : f32 to vector<128x128xf32>
    %20 = arith.addf %19, %18 : vector<128x128xf32>
    %21 = arith.mulf %16, %20 : vector<128x128xf32>
    %cst_12 = arith.constant 1.42141378 : f32
    %22 = vector.broadcast %cst_12 : f32 to vector<128x128xf32>
    %23 = arith.addf %22, %21 : vector<128x128xf32>
    %24 = arith.mulf %16, %23 : vector<128x128xf32>
    %cst_13 = arith.constant -0.284496725 : f32
    %25 = vector.broadcast %cst_13 : f32 to vector<128x128xf32>
    %26 = arith.addf %25, %24 : vector<128x128xf32>
    %27 = arith.mulf %16, %26 : vector<128x128xf32>
    %cst_14 = arith.constant 0.254829586 : f32
    %28 = vector.broadcast %cst_14 : f32 to vector<128x128xf32>
    %29 = arith.addf %28, %27 : vector<128x128xf32>
    %30 = arith.mulf %16, %29 : vector<128x128xf32>
    %cst_15 = arith.constant 0.000000e+00 : f32
    %31 = vector.broadcast %cst_15 : f32 to vector<128x128xf32>
    %32 = arith.subf %31, %10 : vector<128x128xf32>
    %33 = arith.mulf %32, %10 : vector<128x128xf32>
    %34 = math.exp %33 : vector<128x128xf32>
    %35 = arith.mulf %30, %34 : vector<128x128xf32>
    %cst_16 = arith.constant 1.000000e+00 : f32
    %36 = vector.broadcast %cst_16 : f32 to vector<128x128xf32>
    %37 = arith.subf %36, %35 : vector<128x128xf32>
    %cst_17 = arith.constant 0.000000e+00 : f32
    %38 = vector.broadcast %cst_17 : f32 to vector<128x128xf32>
    %39 = arith.cmpf oge, %9, %38 : vector<128x128xf32>
    %cst_18 = arith.constant 0.000000e+00 : f32
    %40 = vector.broadcast %cst_18 : f32 to vector<128x128xf32>
    %41 = arith.subf %40, %37 : vector<128x128xf32>
    %42 = arith.select %39, %37, %41 : vector<128x128xi1>, vector<128x128xf32>
    %cst_19 = arith.constant 1.000000e+00 : f32
    %43 = vector.broadcast %cst_19 : f32 to vector<128x128xf32>
    %44 = arith.addf %43, %42 : vector<128x128xf32>
    %45 = arith.mulf %7, %44 : vector<128x128xf32>
    %c0_20 = arith.constant 0 : index
    %c0_21 = arith.constant 0 : index
    %46 = vector.load %arg4[%c0_20, %c0_21] : memref<128x32xf32, #tpu.memory_space<vmem>>, vector<128x32xf32>
    %cst_22 = arith.constant dense<0.000000e+00> : vector<128x32xf32>
    %47 = tpu.matmul %45, %46, %cst_22 {dimension_numbers = #tpu.dot_dimension_numbers<[1], [0], [0], [1], [0, 0, 1, 1], [], []>} : vector<128x128xf32>, vector<128x32xf32>, vector<128x32xf32> -> vector<128x32xf32>
    %c0_23 = arith.constant 0 : index
    %c0_24 = arith.constant 0 : index
    %48 = vector.load %arg5[%c0_23, %c0_24] : memref<1x32xf32, #tpu.memory_space<vmem>>, vector<1x32xf32>
    %49 = vector.broadcast %48 : vector<1x32xf32> to vector<128x32xf32>
    %50 = arith.addf %47, %49 : vector<128x32xf32>
    %c0_25 = arith.constant 0 : index
    %c0_26 = arith.constant 0 : index
    %51 = vector.load %arg6[%c0_25, %c0_26] : memref<128x32xf32, #tpu.memory_space<vmem>>, vector<128x32xf32>
    tpu.vector_store %arg6[%c0_25, %c0_26], %50 {strides = array<i32>} : memref<128x32xf32, #tpu.memory_space<vmem>>, vector<128x32xf32>,
    return
  }
  func.func @transform_0(%arg0: i32) -> (i32, i32) {
    %c0_i32 = arith.constant 0 : i32
    %c0_i32_0 = arith.constant 0 : i32
    return %arg0, %c0_i32 : i32, i32
  }
  func.func @transform_1(%arg0: i32) -> (i32, i32) {
    %c0_i32 = arith.constant 0 : i32
    %c0_i32_0 = arith.constant 0 : i32
    %c0_i32_1 = arith.constant 0 : i32
    return %c0_i32, %c0_i32_0 : i32, i32
  }
  func.func @transform_2(%arg0: i32) -> (i32, i32) {
    %c0_i32 = arith.constant 0 : i32
    %c0_i32_0 = arith.constant 0 : i32
    %c0_i32_1 = arith.constant 0 : i32
    return %c0_i32, %c0_i32_0 : i32, i32
  }
  func.func @transform_3(%arg0: i32) -> (i32, i32) {
    %c0_i32 = arith.constant 0 : i32
    %c0_i32_0 = arith.constant 0 : i32
    %c0_i32_1 = arith.constant 0 : i32
    return %c0_i32, %c0_i32_0 : i32, i32
  }
  func.func @transform_4(%arg0: i32) -> (i32, i32) {
    %c0_i32 = arith.constant 0 : i32
    %c0_i32_0 = arith.constant 0 : i32
    %c0_i32_1 = arith.constant 0 : i32
    return %c0_i32, %c0_i32_0 : i32, i32
  }
  func.func @transform_5(%arg0: i32) -> (i32, i32) {
    %c0_i32 = arith.constant 0 : i32
    %c0_i32_0 = arith.constant 0 : i32
    return %arg0, %c0_i32 : i32, i32
  }
}

</mosaic_0001>

<bundles_post_ra>
// kernel: tpu_custom_call.1
= control target key start
LH: loop header
LB: loop body
LE: loop exit
PB: predicated region body
PF: predicated region fallthrough
CT: control target
= control target key end

     0   :  { %vm47_vm0 = vcmask 261120   ;;  %s1732_s1 = inlined_call_operand.vmem [shape: f32[32,128], index: 1, kind: input, shape index: {}]   ;;  %s1733_s0 = inlined_call_operand.vmem [shape: f32[128,32], index: 0, kind: input, shape index: {}]   ;;  %s1734_s3 = inlined_call_operand.vmem [shape: f32[128,32], index: 3, kind: input, shape index: {}]   ;;  %s1735_s2 = inlined_call_operand.vmem [shape: f32[1,128], index: 2, kind: input, shape index: {}]   ;;  %s1736_s4 = inlined_call_operand.vmem [shape: f32[1,32], index: 4, kind: input, shape index: {}]   ;;  %s1737_s5 = inlined_call_operand.vmem [shape: f32[128,32], index: 5, kind: output, shape index: {}]  }
   0x1   :  { %v36_v0 = vld [vmem:[%s1732_s1] sm:$0xff]  ;;  %v37_v1 = vld [vmem:[%s1732_s1 + $0x8] sm:$0xff]  ;;  %v38_v2 = vld [vmem:[%s1732_s1 + $0x10] sm:$0xff] }
   0x2   :  { %v1019_v3 = vpack.c.bf16 %v37_v1, %v36_v0  ;;  %v39_v4 = vld [vmem:[%s1732_s1 + $0x18] sm:$0xff]  ;;  %v20_v5 = vld [vmem:[%s1733_s0] sm:$0xff]  ;;  %v21_v7 = vld [vmem:[%s1733_s0 + $0x8] sm:$0xff] }
   0x3   :  { %v1023_v6 = vpack.c.bf16 %v39_v4, %v38_v2  ;;  %939 = vmatprep.mubr.msk.f32.mxu0 %vm47_vm0, %v20_v5  ;;  %v22_v8 = vld [vmem:[%s1733_s0 + $0x10] sm:$0xff]  ;;  %v23_v9 = vld [vmem:[%s1733_s0 + $0x18] sm:$0xff]  ;;  %v24_v10 = vld [vmem:[%s1733_s0 + $0x20] sm:$0xff] }
   0x4   :  { %1020 = vmatprep.subr.bf16.mxu0 %v1019_v3  ;;  %v25_v11 = vld [vmem:[%s1733_s0 + $0x28] sm:$0xff]  ;;  %v26_v12 = vld [vmem:[%s1733_s0 + $0x30] sm:$0xff]  ;;  %v27_v13 = vld [vmem:[%s1733_s0 + $0x38] sm:$0xff] }
   0x5   :  { %1022 = vmatpush3.bf16.msra.mxu0 %v1019_v3  ;;  %v28_v14 = vld [vmem:[%s1733_s0 + $0x40] sm:$0xff]  ;;  %v29_v15 = vld [vmem:[%s1733_s0 + $0x48] sm:$0xff]  ;;  %v30_v16 = vld [vmem:[%s1733_s0 + $0x50] sm:$0xff] }
   0x6   :  { %1024 = vmatprep.subr.bf16.mxu0 %v1023_v6  ;;  %v31_v17 = vld [vmem:[%s1733_s0 + $0x58] sm:$0xff]  ;;  %v32_v18 = vld [vmem:[%s1733_s0 + $0x60] sm:$0xff]  ;;  %v33_v19 = vld [vmem:[%s1733_s0 + $0x68] sm:$0xff] }
   0x7   :  { %v34_v20 = vld [vmem:[%s1733_s0 + $0x70] sm:$0xff]  ;;  %v35_v21 = vld [vmem:[%s1733_s0 + $0x78] sm:$0xff]  ;;  %v673_v22 = vld [vmem:[%s1734_s3] sm:$0xff] }
   0x8   :  { %v674_v23 = vld [vmem:[%s1734_s3 + $0x8] sm:$0xff]  ;;  %v675_v25 = vld [vmem:[%s1734_s3 + $0x10] sm:$0xff]  ;;  %v676_v26 = vld [vmem:[%s1734_s3 + $0x18] sm:$0xff] }
   0x9   :  { %1026 = vmatpush3.bf16.msra.mxu0 %v1023_v6  ;;  %v1027_v24 = vpack.c.bf16 %v674_v23, %v673_v22  ;;  %v1031_v27 = vpack.c.bf16 %v676_v26, %v675_v25  ;;  %v677_v28 = vld [vmem:[%s1734_s3 + $0x20] sm:$0xff]  ;;  %v678_v29 = vld [vmem:[%s1734_s3 + $0x28] sm:$0xff]  ;;  %v679_v31 = vld [vmem:[%s1734_s3 + $0x30] sm:$0xff] }
   0xa   :  { %v1035_v30 = vpack.c.bf16 %v678_v29, %v677_v28  ;;  %v680_v32 = vld [vmem:[%s1734_s3 + $0x38] sm:$0xff]  ;;  %v681_v34 = vld [vmem:[%s1734_s3 + $0x40] sm:$0xff]  ;;  %v682_v35 = vld [vmem:[%s1734_s3 + $0x48] sm:$0xff] }
   0xb   :  { %1028 = vmatprep.subr.bf16.mxu0 %v1027_v24  ;;  %1059 = vmatprep.subr.bf16.mxu1 %v1027_v24  ;;  %v1039_v33 = vpack.c.bf16 %v680_v32, %v679_v31  ;;  %v1043_v36 = vpack.c.bf16 %v682_v35, %v681_v34  ;;  %v683_v37 = vld [vmem:[%s1734_s3 + $0x50] sm:$0xff]  ;;  %v684_v38 = vld [vmem:[%s1734_s3 + $0x58] sm:$0xff]  ;;  %v685_v40 = vld [vmem:[%s1734_s3 + $0x60] sm:$0xff] }
   0xc   :  { %940 = vmatmul.mubr.msk.f32.vlgmr.msra.gmra.mrb[0].mxu0 %vm47_vm0, %v21_v7  ;;  %1067 = vmatpush3.bf16.msra.mxu1 %v1027_v24  ;;  %v1047_v39 = vpack.c.bf16 %v684_v38, %v683_v37  ;;  %v686_v41 = vld [vmem:[%s1734_s3 + $0x68] sm:$0xff]  ;;  %v687_v42 = vld [vmem:[%s1734_s3 + $0x70] sm:$0xff]  ;;  %v688_v44 = vld [vmem:[%s1734_s3 + $0x78] sm:$0xff] }
   0xd   :  { %942 = vmatprep.mubr.msk.f32.mxu0 %vm47_vm0, %v22_v8  ;;  %1030 = vmatpush3.bf16.msra.mxu0 %v1027_v24  ;;  %v1051_v43 = vpack.c.bf16 %v686_v41, %v685_v40  ;;  %v1055_v45 = vpack.c.bf16 %v688_v44, %v687_v42  ;;  %v1296_v46 = vld [vmem:[%s1735_s2] ss:$0 sm:$0xff] }
   0xe   :  { %1032 = vmatprep.subr.bf16.mxu0 %v1031_v27  ;;  %1060 = vmatprep.subr.bf16.mxu1 %v1031_v27 }
  0x10   :  { %943 = vmatmul.mubr.msk.f32.gmra.mrb[2].mxu0 %vm47_vm0, %v23_v9  ;;  %1068 = vmatpush3.bf16.msra.mxu1 %v1031_v27 }
  0x11   :  { %945 = vmatprep.mubr.msk.f32.mxu0 %vm47_vm0, %v24_v10  ;;  %1034 = vmatpush3.bf16.msra.mxu0 %v1031_v27 }
  0x12   :  { %1036 = vmatprep.subr.bf16.mxu0 %v1035_v30  ;;  %1061 = vmatprep.subr.bf16.mxu1 %v1035_v30 }
  0x14   :  { %946 = vmatmul.mubr.msk.f32.gmra.mrb[4].mxu0 %vm47_vm0, %v25_v11  ;;  %1069 = vmatpush3.bf16.msra.mxu1 %v1035_v30 }
  0x15   :  { %948 = vmatprep.mubr.msk.f32.mxu0 %vm47_vm0, %v26_v12  ;;  %1038 = vmatpush3.bf16.msra.mxu0 %v1035_v30 }
  0x16   :  { %1040 = vmatprep.subr.bf16.mxu0 %v1039_v33  ;;  %1062 = vmatprep.subr.bf16.mxu1 %v1039_v33 }
  0x18   :  { %949 = vmatmul.mubr.msk.f32.gmra.mrb[6].mxu0 %vm47_vm0, %v27_v13  ;;  %1070 = vmatpush3.bf16.msra.mxu1 %v1039_v33 }
  0x19   :  { %951 = vmatprep.mubr.msk.f32.mxu0 %vm47_vm0, %v28_v14  ;;  %1042 = vmatpush3.bf16.msra.mxu0 %v1039_v33 }
  0x1a   :  { %1044 = vmatprep.subr.bf16.mxu0 %v1043_v36  ;;  %1063 = vmatprep.subr.bf16.mxu1 %v1043_v36 }
  0x1c   :  { %952 = vmatmul.mubr.msk.f32.gmra.mrb[8].mxu0 %vm47_vm0, %v29_v15  ;;  %1071 = vmatpush3.bf16.msra.mxu1 %v1043_v36 }
  0x1d   :  { %954 = vmatprep.mubr.msk.f32.mxu0 %vm47_vm0, %v30_v16  ;;  %1046 = vmatpush3.bf16.msra.mxu0 %v1043_v36 }
  0x1e   :  { %1048 = vmatprep.subr.bf16.mxu0 %v1047_v39  ;;  %1064 = vmatprep.subr.bf16.mxu1 %v1047_v39 }
  0x20   :  { %955 = vmatmul.mubr.msk.f32.gmra.mrb[10].mxu0 %vm47_vm0, %v31_v17  ;;  %1072 = vmatpush3.bf16.msra.mxu1 %v1047_v39 }
  0x21   :  { %957 = vmatprep.mubr.msk.f32.mxu0 %vm47_vm0, %v32_v18  ;;  %1050 = vmatpush3.bf16.msra.mxu0 %v1047_v39 }
  0x22   :  { %1052 = vmatprep.subr.bf16.mxu0 %v1051_v43  ;;  %1065 = vmatprep.subr.bf16.mxu1 %v1051_v43 }
  0x24   :  { %958 = vmatmul.mubr.msk.f32.gmra.mrb[12].mxu0 %vm47_vm0, %v33_v19  ;;  %1073 = vmatpush3.bf16.msra.mxu1 %v1051_v43 }
  0x25   :  { %960 = vmatprep.mubr.msk.f32.mxu0 %vm47_vm0, %v34_v20  ;;  %1054 = vmatpush3.bf16.msra.mxu0 %v1051_v43 }
  0x26   :  { %1056 = vmatprep.subr.bf16.mxu0 %v1055_v45  ;;  %1066 = vmatprep.subr.bf16.mxu1 %v1055_v45 }
  0x28   :  { %961 = vmatmul.mubr.msk.f32.gmra.mrb[14].mxu0 %vm47_vm0, %v35_v21  ;;  %1074 = vmatpush3.bf16.msra.mxu1 %v1055_v45 }
  0x29   :  { %1058 = vmatpush3.bf16.msra.mxu0 %v1055_v45 }
  0xdf   :  { %v941_v47 = vpop.f32.mrb[0].mxu0 }
  0xe0   :  { %v1299_v48 = vadd.f32 %v941_v47, %v1296_v46  ;;  %v162_v49 = vpop.f32.mrb[1].mxu0 }
  0xe1   :  { %v1302_v50 = vadd.f32 %v1296_v46, %v162_v49 }
  0xe2   :  { %v1305_v51 = vmul.f32 0.70710677, %v1299_v48  ;;  %v1361_v49 = vmul.f32 0.5, %v1299_v48 }
  0xe3   :  { %v1308_v52 = vmul.f32 0.70710677, %v1302_v50  ;;  %v944_v53 = vpop.f32.mrb[2].mxu0 }
  0xe4   :  { %v274_v54 = vand.u32 2147483647, %v1305_v51  ;;  %v1312_v55 = vadd.f32 %v944_v53, %v1296_v46  ;;  %v172_v56 = vpop.f32.mrb[3].mxu0  ;;  %vm594_vm1 = vcmp.ge.f32.partialorder %v1305_v51, 0.0 }
  0xe5   :  { %v273_v57 = vand.u32 2147483647, %v1308_v52  ;;  %v1316_v58 = vadd.f32 %v1296_v46, %v172_v56  ;;  %vm593_vm2 = vcmp.ge.f32.partialorder %v1308_v52, 0.0 }
  0xe6   :  { %v290_v59 = vmul.f32 0.3275911, %v274_v54  ;;  %v1319_v60 = vmul.f32 0.70710677, %v1312_v55  ;;  %v498_v63 = vsub.f32 0.0, %v274_v54 }
  0xe7   :  { %v1322_v61 = vmul.f32 0.70710677, %v1316_v58  ;;  %v947_v1 = vpop.f32.mrb[4].mxu0  ;;  %v497_v2 = vsub.f32 0.0, %v273_v57  ;;  %v289_v5 = vmul.f32 0.3275911, %v273_v57 }
  0xe8   :  { %v306_v62 = vadd.f32 1.0, %v290_v59  ;;  %v276_v0 = vand.u32 2147483647, %v1319_v60  ;;  %v182_v4 = vpop.f32.mrb[5].mxu0  ;;  %v514_v8 = vmul.f32 %v498_v63, %v274_v54  ;;  %v1327_v9 = vadd.f32 %v947_v1, %v1296_v46 }
  0xe9   :  { %v275_v3 = vand.u32 2147483647, %v1322_v61  ;;  %v513_v11 = vmul.f32 %v497_v2, %v273_v57  ;;  %v1330_v13 = vadd.f32 %v1296_v46, %v182_v4  ;;  %v305_v16 = vadd.f32 1.0, %v289_v5 }
  0xea   :  { %1075 = vrcp.f32 %v306_v62  ;;  %v500_v6 = vsub.f32 0.0, %v276_v0  ;;  %v292_v14 = vmul.f32 0.3275911, %v276_v0  ;;  %v1333_v15 = vmul.f32 0.70710677, %v1327_v9 }
  0xeb   :  { %v950_v7 = vpop.f32.mrb[6].mxu0  ;;  %v499_v12 = vsub.f32 0.0, %v275_v3  ;;  %v291_v18 = vmul.f32 0.3275911, %v275_v3  ;;  %v1336_v19 = vmul.f32 0.70710677, %v1330_v13  ;;  %1077 = vrcp.f32 %v305_v16 }
  0xec   :  { %v192_v10 = vpop.f32.mrb[7].mxu0  ;;  %v516_v17 = vmul.f32 %v500_v6, %v276_v0  ;;  %v531_v21 = vmul.f32 1.442695, %v514_v8  ;;  %v278_v22 = vand.u32 2147483647, %v1333_v15  ;;  %v1340_v23 = vadd.f32 %v950_v7, %v1296_v46 }
  0xed   :  { %v529_v25 = vmul.f32 1.442695, %v513_v11  ;;  %v515_v26 = vmul.f32 %v499_v12, %v275_v3  ;;  %v277_v27 = vand.u32 2147483647, %v1336_v19  ;;  %v1344_v28 = vadd.f32 %v1296_v46, %v192_v10 }
  0xee   :  { %v308_v29 = vadd.f32 1.0, %v292_v14  ;;  %v294_v30 = vmul.f32 0.3275911, %v278_v22  ;;  %v1347_v31 = vmul.f32 0.70710677, %v1340_v23  ;;  %v307_v33 = vadd.f32 1.0, %v291_v18 }
  0xef   :  { %v953_v20 = vpop.f32.mrb[8].mxu0  ;;  %v535_v32 = vmul.f32 1.442695, %v516_v17  ;;  %v1350_v34 = vmul.f32 0.70710677, %v1344_v28  ;;  %1079 = vpow2.f32 %v531_v21  ;;  %v502_v37 = vsub.f32 0.0, %v278_v22 }
  0xf0   :  { %v202_v24 = vpop.f32.mrb[9].mxu0  ;;  %v293_v38 = vmul.f32 0.3275911, %v277_v27  ;;  %v280_v39 = vand.u32 2147483647, %v1347_v31  ;;  %1081 = vpow2.f32 %v529_v25  ;;  %v501_v43 = vsub.f32 0.0, %v277_v27 }
  0xf1   :  { %v533_v42 = vmul.f32 1.442695, %v515_v26  ;;  %1083 = vrcp.f32 %v308_v29  ;;  %v310_v44 = vadd.f32 1.0, %v294_v30  ;;  %v279_v45 = vand.u32 2147483647, %v1350_v34 }
  0xf2   :  { %v1358_v47 = vadd.f32 %v953_v20, %v1296_v46  ;;  %1085 = vrcp.f32 %v307_v33  ;;  %v518_v54 = vmul.f32 %v502_v37, %v278_v22  ;;  %v309_v56 = vadd.f32 1.0, %v293_v38 }
  0xf3   :  { %v956_v35 = vpop.f32.mrb[10].mxu0  ;;  %1087 = vpow2.f32 %v535_v32  ;;  %v504_v57 = vsub.f32 0.0, %v280_v39  ;;  %v517_v63 = vmul.f32 %v501_v43, %v277_v27  ;;  %v296_v0 = vmul.f32 0.3275911, %v280_v39 }
  0xf4   :  { %v1352_v36 = vpop.eup %1075  ;;  %v212_v40 = vpop.f32.mrb[11].mxu0  ;;  %1089 = vpow2.f32 %v533_v42  ;;  %v1367_v2 = vmul.f32 0.5, %v1302_v50  ;;  %v503_v48 = vsub.f32 0.0, %v279_v45  ;;  %v1370_v3 = vmul.f32 0.70710677, %v1358_v47 }
  0xf5   :  { %v354_v41 = vmul.f32 1.0614054, %v1352_v36  ;;  %1091 = vrcp.f32 %v310_v44  ;;  %v295_v5 = vmul.f32 0.3275911, %v279_v45  ;;  %v1373_v6 = vadd.f32 %v1296_v46, %v202_v24  ;;  %v1383_v14 = vpop.eup %1077 }
  0xf6   :  { %v1376_v7 = vadd.f32 %v956_v35, %v1296_v46  ;;  %v539_v10 = vmul.f32 1.442695, %v518_v54  ;;  %1093 = vrcp.f32 %v309_v56  ;;  %v520_v11 = vmul.f32 %v504_v57, %v280_v39 }
  0xf7   :  { %v370_v53 = vadd.f32 -1.4531521, %v354_v41  ;;  %v959_v59 = vpop.f32.mrb[12].mxu0  ;;  %v282_v50 = vand.u32 2147483647, %v1370_v3  ;;  %v312_v18 = vadd.f32 1.0, %v296_v0  ;;  %v519_v22 = vmul.f32 %v503_v48, %v279_v45 }
  0xf8   :  { %v1364_v1 = vpop.f32.mrb[13].mxu0  ;;  %1752 = vst [vmem:[#allocation2_spill] sm:$0xff] %v1376_v7  ;;  %v537_v17 = vmul.f32 1.442695, %v517_v63  ;;  %v1387_v20 = vmul.f32 0.70710677, %v1373_v6  ;;  %v1396_v33 = vadd.f32 %v1296_v46, %v212_v40  ;;  %1095 = vpow2.f32 %v539_v10 }
  0xf9   :  { %v386_v62 = vmul.f32 %v1352_v36, %v370_v53  ;;  %v1080_v21 = vpop.eup %1079  ;;  %v298_v24 = vmul.f32 0.3275911, %v282_v50  ;;  %v506_v25 = vsub.f32 0.0, %v282_v50  ;;  %v1390_v26 = vmul.f32 0.70710677, %v1376_v7 }
  0xfa   :  { %v1392_v27 = vpop.eup %1081  ;;  %v311_v30 = vadd.f32 1.0, %v295_v5  ;;  %v281_v32 = vand.u32 2147483647, %v1387_v20  ;;  %1754 = vst [vmem:[#allocation4_spill] sm:$0xff] %v1396_v33  ;;  %v543_v37 = vmul.f32 1.442695, %v520_v11  ;;  %1097 = vpow2.f32 %v537_v17 }
  0xfb   :  { %v402_v4 = vadd.f32 1.4214138, %v386_v62  ;;  %v1378_v8 = vpop.f32.mrb[14].mxu0  ;;  %1753 = vst [vmem:[#allocation3_spill] sm:$0xff] %v1390_v26  ;;  %v1398_v35 = vpop.eup %1083  ;;  %v522_v38 = vmul.f32 %v506_v25, %v282_v50  ;;  %v284_v39 = vand.u32 2147483647, %v1390_v26  ;;  %1099 = vrcp.f32 %v312_v18 }
  0xfc   :  { %v1381_v12 = vpop.f32.mrb[15].mxu0  ;;  %v1401_v41 = vpop.eup %1085  ;;  %v297_v43 = vmul.f32 0.3275911, %v281_v32  ;;  %v505_v44 = vsub.f32 0.0, %v281_v32  ;;  %v541_v53 = vmul.f32 1.442695, %v519_v22  ;;  %1101 = vrcp.f32 %v311_v30 }
  0xfd   :  { %v418_v16 = vmul.f32 %v1352_v36, %v402_v4  ;;  %v1404_v45 = vpop.eup %1087  ;;  %v314_v40 = vadd.f32 1.0, %v298_v24  ;;  %v508_v54 = vsub.f32 0.0, %v284_v39  ;;  %v300_v62 = vmul.f32 0.3275911, %v284_v39 }
  0xfe   :  { %v1406_v56 = vpop.eup %1089  ;;  %v1409_v63 = vmul.f32 0.70710677, %v1396_v33  ;;  %1103 = vpow2.f32 %v543_v37  ;;  %v547_v48 = vmul.f32 1.442695, %v522_v38  ;;  %v1415_v4 = vadd.f32 %v959_v59, %v1296_v46 }
  0xff   :  { %v434_v29 = vadd.f32 -0.28449672, %v418_v16  ;;  %v1411_v0 = vpop.eup %1091  ;;  %v313_v10 = vadd.f32 1.0, %v297_v43  ;;  %v521_v11 = vmul.f32 %v505_v44, %v281_v32  ;;  %v1422_v17 = vmul.f32 0.5, %v1312_v55 }
 0x100   :  { %1755 = vst [vmem:[#allocation5_spill] sm:$0xff] %v1409_v63  ;;  %1756 = vst [vmem:[#allocation6_spill] sm:$0xff] %v1415_v4  ;;  %v283_v50 = vand.u32 2147483647, %v1409_v63  ;;  %v1419_v16 = vpop.eup %1093  ;;  %v1425_v18 = vmul.f32 0.5, %v1316_v58  ;;  %1105 = vpow2.f32 %v541_v53  ;;  %v524_v22 = vmul.f32 %v508_v54, %v284_v39 }
 0x101   :  { %v450_v42 = vmul.f32 %v1352_v36, %v434_v29  ;;  %1107 = vrcp.f32 %v314_v40  ;;  %v316_v59 = vadd.f32 1.0, %v300_v62  ;;  %v1428_v29 = vmul.f32 0.70710677, %v1415_v4 }
 0x102   :  { %v507_v25 = vsub.f32 0.0, %v283_v50  ;;  %1109 = vpow2.f32 %v547_v48  ;;  %v1432_v30 = vadd.f32 %v1296_v46, %v1364_v1  ;;  %v545_v32 = vmul.f32 1.442695, %v521_v11 }
 0x103   :  { %v466_v57 = vadd.f32 0.2548296, %v450_v42  ;;  %1757 = vst [vmem:[#allocation7_spill] sm:$0xff] %v1428_v29  ;;  %1111 = vrcp.f32 %v313_v10  ;;  %v1436_v58 = vadd.f32 %v1378_v8, %v1296_v46  ;;  %v551_v37 = vmul.f32 1.442695, %v524_v22 }
 0x104   :  { %1758 = vst [vmem:[#allocation8_spill] sm:$0xff] %v1432_v30  ;;  %v523_v38 = vmul.f32 %v507_v25, %v283_v50  ;;  %v286_v39 = vand.u32 2147483647, %v1428_v29  ;;  %v1442_v42 = vmul.f32 0.70710677, %v1432_v30  ;;  %v1447_v44 = vmul.f32 0.5, %v1327_v9 }
 0x105   :  { %v482_v5 = vmul.f32 %v1352_v36, %v466_v57  ;;  %v299_v36 = vmul.f32 0.3275911, %v283_v50  ;;  %1759 = vst [vmem:[#allocation9_spill] sm:$0xff] %v1436_v58  ;;  %1113 = vrcp.f32 %v316_v59  ;;  %v1451_v8 = vadd.f32 %v1296_v46, %v1381_v12 }
 0x106   :  { %1760 = vst [vmem:[#allocation10_spill] sm:$0xff] %v1442_v42  ;;  %v302_v54 = vmul.f32 0.3275911, %v286_v39  ;;  %v510_v57 = vsub.f32 0.0, %v286_v39  ;;  %v285_v62 = vand.u32 2147483647, %v1442_v42  ;;  %1115 = vpow2.f32 %v545_v32 }
 0x107   :  { %v562_v24 = vmul.f32 %v1080_v21, %v482_v5  ;;  %v1438_v21 = vpop.eup %1095  ;;  %1761 = vst [vmem:[#allocation11_spill] sm:$0xff] %v1451_v8  ;;  %v315_v40 = vadd.f32 1.0, %v299_v36  ;;  %v1461_v9 = vmul.f32 0.5, %v1330_v13  ;;  %v1464_v10 = vmul.f32 0.70710677, %v1436_v58 }
 0x108   :  { %v1444_v43 = vpop.eup %1097  ;;  %1117 = vpow2.f32 %v551_v37  ;;  %v549_v12 = vmul.f32 1.442695, %v523_v38  ;;  %v526_v11 = vmul.f32 %v510_v57, %v286_v39  ;;  %v301_v50 = vmul.f32 0.3275911, %v285_v62 }
 0x109   :  { %v578_v55 = vsub.f32 1.0, %v562_v24  ;;  %v1453_v53 = vpop.eup %1099  ;;  %1762 = vst [vmem:[#allocation12_spill] sm:$0xff] %v1464_v10  ;;  %v318_v22 = vadd.f32 1.0, %v302_v54  ;;  %v509_v24 = vsub.f32 0.0, %v285_v62  ;;  %v288_v59 = vand.u32 2147483647, %v1464_v10 }
 0x10a   :  { %v1456_v48 = vpop.eup %1101  ;;  %v1470_v51 = vmul.f32 0.70710677, %v1451_v8  ;;  %v1475_v36 = vmul.f32 0.5, %v1340_v23  ;;  %1119 = vrcp.f32 %v315_v40  ;;  %v317_v37 = vadd.f32 1.0, %v301_v50 }
 0x10b   :  { %v610_v1 = vsub.f32 0.0, %v578_v55  ;;  %v1466_v46 = vpop.eup %1103  ;;  %v525_v38 = vmul.f32 %v509_v24, %v285_v62  ;;  %v304_v39 = vmul.f32 0.3275911, %v288_v59  ;;  %1121 = vpow2.f32 %v549_v12 }
 0x10c   :  { %1763 = vst [vmem:[#allocation13_spill] sm:$0xff] %v1470_v51  ;;  %v1472_v25 = vpop.eup %1105  ;;  %v512_v57 = vsub.f32 0.0, %v288_v59  ;;  %v353_v58 = vmul.f32 1.0614054, %v1383_v14  ;;  %v1487_v23 = vmul.f32 0.5, %v1358_v47  ;;  %v1490_v40 = vmul.f32 0.5, %v1373_v6 }
 0x10d   :  { %v626_v5 = vsel %vm594_vm1, %v578_v55, %v610_v1  ;;  %v555_v55 = vmul.f32 1.442695, %v526_v11  ;;  %v1477_v32 = vpop.eup %1107  ;;  %v287_v1 = vand.u32 2147483647, %v1470_v51  ;;  %1123 = vrcp.f32 %v318_v22 }
 0x10e   :  { %v642_v13 = vadd.f32 1.0, %v626_v5  ;;  %v1480_v54 = vpop.eup %1109  ;;  %v355_v5 = vmul.f32 1.0614054, %v1401_v41  ;;  %1764 = vst [vmem:[#allocation14_spill] sm:$0xff] %v1487_v23  ;;  %v553_v62 = vmul.f32 1.442695, %v525_v38  ;;  %v1498_v47 = vmul.f32 %v512_v57, %v288_v59 }
 0x10f   :  { %v1484_v10 = vpop.eup %1111  ;;  %1125 = vpow2.f32 %v555_v55  ;;  %v320_v11 = vadd.f32 1.0, %v304_v39  ;;  %v511_v50 = vsub.f32 0.0, %v287_v1  ;;  %v369_v24 = vadd.f32 -1.4531521, %v353_v58 }
 0x110   :  { %v1492_v12 = vpop.eup %1113  ;;  %v1495_v8 = vmul.f32 %v642_v13, %v1361_v49  ;;  %1127 = vrcp.f32 %v317_v37  ;;  %v371_v4 = vadd.f32 -1.4531521, %v355_v5  ;;  %v356_v51 = vmul.f32 1.0614054, %v1398_v35 }
 0x111   :  { %v303_v30 = vmul.f32 0.3275911, %v287_v1  ;;  %v527_v6 = vmul.f32 %v511_v50, %v287_v1  ;;  %v385_v22 = vmul.f32 %v1383_v14, %v369_v24  ;;  %v1501_v38 = vpop.eup %1115  ;;  %1129 = vpow2.f32 %v553_v62 }
 0x112   :  { %v387_v58 = vmul.f32 %v1401_v41, %v371_v4  ;;  %v372_v55 = vadd.f32 -1.4531521, %v356_v51  ;;  %v357_v39 = vmul.f32 1.0614054, %v1419_v16  ;;  %v1505_v49 = vpop.eup %1117  ;;  %1131 = vrcp.f32 %v320_v11 }
 0x113   :  { %1765 = vst [vmem:[#allocation15_spill] sm:$0xff] %v1505_v49  ;;  %v401_v13 = vadd.f32 1.4214138, %v385_v22  ;;  %v358_v37 = vmul.f32 1.0614054, %v1411_v0  ;;  %v1509_v59 = vmul.f32 0.5, %v1344_v28 }
 0x114   :  { %v403_v1 = vadd.f32 1.4214138, %v387_v58  ;;  %v388_v57 = vmul.f32 %v1398_v35, %v372_v55  ;;  %v373_v5 = vadd.f32 -1.4531521, %v357_v39  ;;  %v359_v62 = vmul.f32 1.0614054, %v1456_v48  ;;  %v1513_v50 = vpop.eup %1119 }
 0x115   :  { %v319_v4 = vadd.f32 1.0, %v303_v30  ;;  %v1515_v51 = vmul.f32 1.442695, %v527_v6  ;;  %v417_v24 = vmul.f32 %v1383_v14, %v401_v13  ;;  %v374_v11 = vadd.f32 -1.4531521, %v358_v37  ;;  %v1520_v58 = vpop.eup %1121 }
 0x116   :  { %v419_v22 = vmul.f32 %v1401_v41, %v403_v1  ;;  %v404_v29 = vadd.f32 1.4214138, %v388_v57  ;;  %v389_v28 = vmul.f32 %v1419_v16, %v373_v5  ;;  %v375_v7 = vadd.f32 -1.4531521, %v359_v62  ;;  %1766 = vst [vmem:[#allocation16_spill] sm:$0xff] %v1520_v58 }
 0x117   :  { %v433_v55 = vadd.f32 -0.28449672, %v417_v24  ;;  %v390_v39 = vmul.f32 %v1411_v0, %v374_v11  ;;  %v360_v23 = vmul.f32 1.0614054, %v1453_v53  ;;  %v361_v30 = vmul.f32 1.0614054, %v1484_v10  ;;  %v1525_v6 = vpop.eup %1123 }
 0x118   :  { %v435_v42 = vadd.f32 -0.28449672, %v419_v22  ;;  %v420_v13 = vmul.f32 %v1398_v35, %v404_v29  ;;  %v405_v37 = vadd.f32 1.4214138, %v389_v28  ;;  %v391_v1 = vmul.f32 %v1456_v48, %v375_v7 }
 0x119   :  { %v1529_v57 = vpop.eup %1125  ;;  %v449_v5 = vmul.f32 %v1383_v14, %v433_v55  ;;  %v406_v62 = vadd.f32 1.4214138, %v390_v39  ;;  %v376_v24 = vadd.f32 -1.4531521, %v360_v23  ;;  %v377_v63 = vadd.f32 -1.4531521, %v361_v30 }
 0x11a   :  { %1767 = vst [vmem:[#allocation17_spill] sm:$0xff] %v1529_v57  ;;  %v1532_v11 = vpop.eup %1127  ;;  %v451_v33 = vmul.f32 %v1401_v41, %v435_v42  ;;  %v436_v49 = vadd.f32 -0.28449672, %v420_v13  ;;  %v421_v58 = vmul.f32 %v1419_v16, %v405_v37  ;;  %v407_v22 = vadd.f32 1.4214138, %v391_v1 }
 0x11b   :  { %v465_v26 = vadd.f32 0.2548296, %v449_v5  ;;  %v422_v29 = vmul.f32 %v1411_v0, %v406_v62  ;;  %v392_v7 = vmul.f32 %v1453_v53, %v376_v24  ;;  %v393_v28 = vmul.f32 %v1484_v10, %v377_v63  ;;  %v1539_v57 = vpop.eup %1129 }
 0x11c   :  { %1768 = vst [vmem:[#allocation18_spill] sm:$0xff] %v1539_v57  ;;  %v467_v23 = vadd.f32 0.2548296, %v451_v33  ;;  %v452_v55 = vmul.f32 %v1398_v35, %v436_v49  ;;  %v437_v39 = vadd.f32 -0.28449672, %v421_v58  ;;  %v423_v42 = vmul.f32 %v1456_v48, %v407_v22  ;;  %v1544_v30 = vpop.eup %1131 }
 0x11d   :  { %vm595_vm3 = vcmp.ge.f32.partialorder %v1322_v61, 0.0  ;;  %v481_v13 = vmul.f32 %v1383_v14, %v465_v26  ;;  %v438_v37 = vadd.f32 -0.28449672, %v422_v29  ;;  %v408_v1 = vadd.f32 1.4214138, %v392_v7 }
 0x11e   :  { %v409_v5 = vadd.f32 1.4214138, %v393_v28  ;;  %v483_v63 = vmul.f32 %v1401_v41, %v467_v23  ;;  %v468_v62 = vadd.f32 0.2548296, %v452_v55  ;;  %v453_v24 = vmul.f32 %v1419_v16, %v437_v39 }
 0x11f   :  { %v439_v33 = vadd.f32 -0.28449672, %v423_v42  ;;  %vm596_vm4 = vcmp.ge.f32.partialorder %v1319_v60, 0.0  ;;  %v561_v49 = vmul.f32 %v1392_v27, %v481_v13  ;;  %v454_v58 = vmul.f32 %v1411_v0, %v438_v37 }
 0x120   :  { %v424_v22 = vmul.f32 %v1453_v53, %v408_v1  ;;  %v425_v57 = vmul.f32 %v1484_v10, %v409_v5  ;;  %v563_v14 = vmul.f32 %v1406_v56, %v483_v63  ;;  %v484_v26 = vmul.f32 %v1398_v35, %v468_v62 }
 0x121   :  { %v469_v29 = vadd.f32 0.2548296, %v453_v24  ;;  %v455_v41 = vmul.f32 %v1456_v48, %v439_v33  ;;  %vm597_vm5 = vcmp.ge.f32.partialorder %v1336_v19, 0.0  ;;  %1133 = vrcp.f32 %v319_v4 }
 0x122   :  { %v577_v7 = vsub.f32 1.0, %v561_v49  ;;  %v470_v28 = vadd.f32 0.2548296, %v454_v58  ;;  %v440_v23 = vadd.f32 -0.28449672, %v424_v22  ;;  %vm598_vm6 = vcmp.ge.f32.partialorder %v1333_v15, 0.0 }
 0x123   :  { %v579_v27 = vsub.f32 1.0, %v563_v14  ;;  %v564_v55 = vmul.f32 %v1404_v45, %v484_v26  ;;  %v485_v39 = vmul.f32 %v1419_v16, %v469_v29  ;;  %v471_v42 = vadd.f32 0.2548296, %v455_v41 }
 0x124   :  { %v609_v56 = vsub.f32 0.0, %v577_v7  ;;  %v486_v35 = vmul.f32 %v1411_v0, %v470_v28  ;;  %v456_v13 = vmul.f32 %v1453_v53, %v440_v23  ;;  %v441_v37 = vadd.f32 -0.28449672, %v425_v57 }
 0x125   :  { %v611_v1 = vsub.f32 0.0, %v579_v27  ;;  %v580_v5 = vsub.f32 1.0, %v564_v55  ;;  %v565_v4 = vmul.f32 %v1444_v43, %v485_v39  ;;  %v487_v63 = vmul.f32 %v1456_v48, %v471_v42 }
 0x126   :  { %vm599_vm7 = vcmp.ge.f32.partialorder %v1350_v34, 0.0  ;;  %v625_v45 = vsel %vm593_vm2, %v577_v7, %v609_v56  ;;  %v566_v16 = vmul.f32 %v1438_v21, %v486_v35  ;;  %v472_v62 = vadd.f32 0.2548296, %v456_v13 }
 0x127   :  { %v457_v24 = vmul.f32 %v1484_v10, %v441_v37  ;;  %v641_v0 = vadd.f32 1.0, %v625_v45  ;;  %v627_v57 = vsel %vm595_vm3, %v579_v27, %v611_v1  ;;  %v612_v33 = vsub.f32 0.0, %v580_v5 }
 0x128   :  { %v581_v49 = vsub.f32 1.0, %v565_v4  ;;  %vm600_vm8 = vcmp.ge.f32.partialorder %v1347_v31, 0.0  ;;  %v643_v43 = vadd.f32 1.0, %v627_v57  ;;  %v582_v48 = vsub.f32 1.0, %v566_v16 }
 0x129   :  { %v567_v58 = vmul.f32 %v1472_v25, %v487_v63  ;;  %v488_v52 = vmul.f32 %v1453_v53, %v472_v62  ;;  %v657_v22 = vmul.f32 %v641_v0, %v1367_v2  ;;  %v628_v21 = vsel %vm596_vm4, %v580_v5, %v612_v33 }
 0x12a   :  { %v613_v14 = vsub.f32 0.0, %v581_v49  ;;  %v473_v26 = vadd.f32 0.2548296, %v457_v24  ;;  %vm601_vm9 = vcmp.ge.f32.partialorder %v1387_v20, 0.0  ;;  %v659_v61 = vmul.f32 %v643_v43, %v1425_v18 }
 0x12b   :  { %v644_v29 = vadd.f32 1.0, %v628_v21  ;;  %v614_v41 = vsub.f32 0.0, %v582_v48  ;;  %v583_v7 = vsub.f32 1.0, %v567_v58  ;;  %995 = vmatprep.mubr.f32.mxu0 %v657_v22  ;;  %v568_v53 = vmul.f32 %v1466_v46, %v488_v52  ;;  %v1586_v28 = vpop.eup %1133 }
 0x12c   :  { %v629_v25 = vsel %vm597_vm5, %v581_v49, %v613_v14  ;;  %v489_v2 = vmul.f32 %v1484_v10, %v473_v26  ;;  %v362_v60 = vmul.f32 1.0614054, %v1477_v32  ;;  %996 = vmatmul.mubr.f32.vlgmr.msra.gmra.mrb[16].mxu0 %v1495_v8  ;;  %v363_v8 = vmul.f32 1.0614054, %v1513_v50 }
 0x12d   :  { %v660_v23 = vmul.f32 %v644_v29, %v1422_v17  ;;  %v645_v18 = vadd.f32 1.0, %v629_v25  ;;  %v630_v27 = vsel %vm598_vm6, %v582_v48, %v614_v41  ;;  %v615_v55 = vsub.f32 0.0, %v583_v7  ;;  %998 = vmatprep.mubr.f32.mxu0 %v659_v61 }
 0x12e   :  { %v646_v19 = vadd.f32 1.0, %v630_v27  ;;  %v584_v39 = vsub.f32 1.0, %v568_v53  ;;  %v569_v46 = vmul.f32 %v1501_v38, %v489_v2  ;;  %v378_v42 = vadd.f32 -1.4531521, %v362_v60 }
 0x12f   :  { %v661_v10 = vmul.f32 %v645_v18, %v1461_v9  ;;  %v631_v56 = vsel %vm599_vm7, %v583_v7, %v615_v55  ;;  %v364_v17 = vmul.f32 1.0614054, %v1492_v12  ;;  %v379_v5 = vadd.f32 -1.4531521, %v363_v8 }
 0x130   :  { %v662_v35 = vmul.f32 %v646_v19, %v1447_v44  ;;  %v647_v15 = vadd.f32 1.0, %v631_v56  ;;  %v616_v13 = vsub.f32 0.0, %v584_v39  ;;  %v585_v37 = vsub.f32 1.0, %v569_v46  ;;  %999 = vmatmul.mubr.f32.gmra.mrb[18].mxu0 %v660_v23 }
 0x131   :  { %v394_v1 = vmul.f32 %v1477_v32, %v378_v42  ;;  %v380_v38 = vadd.f32 -1.4531521, %v364_v17  ;;  %v365_v4 = vmul.f32 1.0614054, %v1532_v11  ;;  %1001 = vmatprep.mubr.f32.mxu0 %v661_v10  ;;  %v366_v45 = vmul.f32 1.0614054, %v1525_v6 }
 0x132   :  { %v663_v34 = vmul.f32 %v647_v15, %v1509_v59  ;;  %v632_v9 = vsel %vm600_vm8, %v584_v39, %v616_v13  ;;  %v617_v63 = vsub.f32 0.0, %v585_v37  ;;  %v395_v62 = vmul.f32 %v1513_v50, %v379_v5 }
 0x133   :  { %v648_v44 = vadd.f32 1.0, %v632_v9  ;;  %v410_v16 = vadd.f32 1.4214138, %v394_v1  ;;  %v396_v24 = vmul.f32 %v1492_v12, %v380_v38  ;;  %v381_v57 = vadd.f32 -1.4531521, %v365_v4  ;;  %v1769_v9 = vld [vmem:[#allocation3_spill] sm:$0xff] }
 0x134   :  { %1004 = vmatprep.mubr.f32.mxu1 %v663_v34  ;;  %v633_v0 = vsel %vm601_vm9, %v585_v37, %v617_v63  ;;  %v382_v33 = vadd.f32 -1.4531521, %v366_v45  ;;  %v367_v59 = vmul.f32 1.0614054, %v1586_v28  ;;  %1002 = vmatmul.mubr.f32.gmra.mrb[20].mxu0 %v662_v35  ;;  %v411_v48 = vadd.f32 1.4214138, %v395_v62 }
 0x135   :  { %v664_v31 = vmul.f32 %v648_v44, %v1475_v36  ;;  %v649_v49 = vadd.f32 1.0, %v633_v0  ;;  %v426_v43 = vmul.f32 %v1477_v32, %v410_v16  ;;  %v412_v58 = vadd.f32 1.4214138, %v396_v24  ;;  %v1770_v45 = vld [vmem:[#allocation16_spill] sm:$0xff]  ;;  %v1771_v62 = vld [vmem:[#allocation15_spill] sm:$0xff] }
 0x136   :  { %v397_v52 = vmul.f32 %v1532_v11, %v381_v57  ;;  %v398_v22 = vmul.f32 %v1525_v6, %v382_v33  ;;  %v383_v21 = vadd.f32 -1.4531521, %v367_v59  ;;  %v427_v26 = vmul.f32 %v1513_v50, %v411_v48  ;;  %v1772_v57 = vld [vmem:[#allocation4_spill] sm:$0xff] }
 0x137   :  { %1005 = vmatmul.mubr.f32.vlgmr.msra.gmra.mrb[0].mxu1 %v664_v31  ;;  %v665_v20 = vmul.f32 %v649_v49, %v1490_v40  ;;  %v442_v14 = vadd.f32 -0.28449672, %v426_v43  ;;  %v368_v61 = vmul.f32 1.0614054, %v1544_v30  ;;  %v428_v36 = vmul.f32 %v1492_v12, %v412_v58  ;;  %v1773_v43 = vld [vmem:[#allocation18_spill] sm:$0xff]  ;;  %v1774_v58 = vld [vmem:[#allocation17_spill] sm:$0xff] }
 0x138   :  { %v413_v29 = vadd.f32 1.4214138, %v397_v52  ;;  %v414_v41 = vadd.f32 1.4214138, %v398_v22  ;;  %v399_v7 = vmul.f32 %v1586_v28, %v383_v21  ;;  %v559_v25 = vmul.f32 1.442695, %v1498_v47 }
 0x139   :  { %1007 = vmatprep.mubr.f32.mxu1 %v665_v20  ;;  %v458_v53 = vmul.f32 %v1477_v32, %v442_v14  ;;  %v443_v2 = vadd.f32 -0.28449672, %v427_v26  ;;  %v384_v60 = vadd.f32 -1.4531521, %v368_v61  ;;  %v444_v23 = vadd.f32 -0.28449672, %v428_v36 }
 0x13a   :  { %v429_v40 = vmul.f32 %v1532_v11, %v413_v29  ;;  %v430_v18 = vmul.f32 %v1525_v6, %v414_v41  ;;  %v415_v27 = vadd.f32 1.4214138, %v399_v7  ;;  %1135 = vpow2.f32 %v1515_v51  ;;  %v1775_v20 = vld [vmem:[#allocation5_spill] sm:$0xff]  ;;  %v1776_v7 = vld [vmem:[#allocation10_spill] sm:$0xff] }
 0x13b   :  { %v474_v55 = vadd.f32 0.2548296, %v458_v53  ;;  %v459_v19 = vmul.f32 %v1513_v50, %v443_v2  ;;  %v400_v39 = vmul.f32 %v1544_v30, %v384_v60  ;;  %v460_v47 = vmul.f32 %v1492_v12, %v444_v23 }
 0x13c   :  { %v445_v46 = vadd.f32 -0.28449672, %v429_v40  ;;  %v446_v42 = vadd.f32 -0.28449672, %v430_v18  ;;  %v431_v10 = vmul.f32 %v1586_v28, %v415_v27  ;;  %1137 = vpow2.f32 %v559_v25 }
 0x13d   :  { %v490_v56 = vmul.f32 %v1477_v32, %v474_v55  ;;  %v475_v8 = vadd.f32 0.2548296, %v459_v19  ;;  %v416_v17 = vadd.f32 1.4214138, %v400_v39  ;;  %v476_v35 = vadd.f32 0.2548296, %v460_v47 }
 0x13e   :  { %v461_v15 = vmul.f32 %v1532_v11, %v445_v46  ;;  %v462_v51 = vmul.f32 %v1525_v6, %v446_v42  ;;  %v447_v13 = vadd.f32 -0.28449672, %v431_v10  ;;  %vm602_vm10 = vcmp.ge.f32.partialorder %v1370_v3, 0.0  ;;  %v1778_v39 = vld [vmem:[#allocation2_spill] sm:$0xff]  ;;  %v1779_v46 = vld [vmem:[#allocation7_spill] sm:$0xff]  ;;  %v1780_v10 = vld [vmem:[#allocation8_spill] sm:$0xff] }
 0x13f   :  { %v570_v37 = vmul.f32 %v1480_v54, %v490_v56  ;;  %v491_v1 = vmul.f32 %v1513_v50, %v475_v8  ;;  %v432_v5 = vmul.f32 %v1544_v30, %v416_v17  ;;  %v492_v38 = vmul.f32 %v1492_v12, %v476_v35 }
 0x140   :  { %v477_v4 = vadd.f32 0.2548296, %v461_v15  ;;  %v478_v32 = vadd.f32 0.2548296, %v462_v51  ;;  %v463_v34 = vmul.f32 %v1586_v28, %v447_v13  ;;  %vm604_vm11 = vcmp.ge.f32.partialorder %v1769_v9, 0.0  ;;  %v1781_v15 = vld [vmem:[#allocation13_spill] sm:$0xff] }
 0x141   :  { %v586_v63 = vsub.f32 1.0, %v570_v37  ;;  %v571_v44 = vmul.f32 %v1770_v45, %v491_v1  ;;  %v448_v16 = vadd.f32 -0.28449672, %v432_v5  ;;  %v572_v24 = vmul.f32 %v1771_v62, %v492_v38  ;;  %v1782_v38 = vld [vmem:[#allocation6_spill] sm:$0xff]  ;;  %v1784_v45 = vld [vmem:[#allocation12_spill] sm:$0xff] }
 0x142   :  { %v493_v54 = vmul.f32 %v1532_v11, %v477_v4  ;;  %v494_v50 = vmul.f32 %v1525_v6, %v478_v32  ;;  %v479_v0 = vadd.f32 0.2548296, %v463_v34  ;;  %v251_v33 = vmul.f32 0.5, %v1772_v57  ;;  %v1783_v32 = vld [vmem:[#allocation11_spill] sm:$0xff]  ;;  %v878_v57 = vld [vmem:[%s1736_s4] ss:$0 sm:$0xff] }
 0x143   :  { %v618_v12 = vsub.f32 0.0, %v586_v63  ;;  %v587_v59 = vsub.f32 1.0, %v571_v44  ;;  %v464_v31 = vmul.f32 %v1544_v30, %v448_v16  ;;  %v588_v49 = vsub.f32 1.0, %v572_v24 }
 0x144   :  { %v573_v48 = vmul.f32 %v1773_v43, %v493_v54  ;;  %v574_v52 = vmul.f32 %v1774_v58, %v494_v50  ;;  %v495_v22 = vmul.f32 %v1586_v28, %v479_v0  ;;  %v1136_v21 = vpop.eup %1135  ;;  %vm603_vm12 = vcmp.ge.f32.partialorder %v1775_v20, 0.0  ;;  %v1777_v28 = vld [vmem:[#allocation14_spill] sm:$0xff]  ;;  %v1785_v54 = vld [vmem:[#allocation9_spill] sm:$0xff] }
 0x145   :  { %v634_v6 = vsel %vm602_vm10, %v586_v63, %v618_v12  ;;  %v619_v11 = vsub.f32 0.0, %v587_v59  ;;  %v480_v14 = vadd.f32 0.2548296, %v464_v31  ;;  %v620_v61 = vsub.f32 0.0, %v588_v49 }
 0x146   :  { %v650_v26 = vadd.f32 1.0, %v634_v6  ;;  %v589_v36 = vsub.f32 1.0, %v573_v48  ;;  %v590_v29 = vsub.f32 1.0, %v574_v52  ;;  %v1138_v41 = vpop.eup %1137  ;;  %vm605_vm13 = vcmp.ge.f32.partialorder %v1776_v7, 0.0 }
 0x147   :  { %v635_v25 = vsel %vm603_vm12, %v587_v59, %v619_v11  ;;  %v575_v53 = vmul.f32 %v1136_v21, %v495_v22  ;;  %v496_v2 = vmul.f32 %v1544_v30, %v480_v14  ;;  %v636_v3 = vsel %vm604_vm11, %v588_v49, %v620_v61 }
 0x148   :  { %v666_v60 = vmul.f32 %v650_v26, %v1777_v28  ;;  %v651_v23 = vadd.f32 1.0, %v635_v25  ;;  %v621_v40 = vsub.f32 0.0, %v589_v36  ;;  %v652_v18 = vadd.f32 1.0, %v636_v3 }
 0x149   :  { %v622_v27 = vsub.f32 0.0, %v590_v29  ;;  %v591_v55 = vsub.f32 1.0, %v575_v53  ;;  %v576_v19 = vmul.f32 %v1138_v41, %v496_v2  ;;  %v252_v47 = vmul.f32 0.5, %v1778_v39 }
 0x14a   :  { %vm606_vm14 = vcmp.ge.f32.partialorder %v1779_v46, 0.0  ;;  %1008 = vmatmul.mubr.f32.gmra.mrb[2].mxu1 %v666_v60  ;;  %v667_v42 = vmul.f32 %v651_v23, %v251_v33  ;;  %v637_v30 = vsel %vm605_vm13, %v589_v36, %v621_v40  ;;  %v253_v56 = vmul.f32 0.5, %v1780_v10 }
 0x14b   :  { %v653_v8 = vadd.f32 1.0, %v637_v30  ;;  %v638_v17 = vsel %vm606_vm14, %v590_v29, %v622_v27  ;;  %v623_v35 = vsub.f32 0.0, %v591_v55  ;;  %vm607_vm15 = vcmp.ge.f32.partialorder %v1781_v15, 0.0 }
 0x14c   :  { %1010 = vmatprep.mubr.f32.mxu1 %v667_v42  ;;  %v668_v51 = vmul.f32 %v652_v18, %v252_v47  ;;  %v654_v13 = vadd.f32 1.0, %v638_v17  ;;  %v592_v37 = vsub.f32 1.0, %v576_v19  ;;  %v254_v4 = vmul.f32 0.5, %v1782_v38 }
 0x14d   :  { %v669_v1 = vmul.f32 %v653_v8, %v253_v56  ;;  %v639_v5 = vsel %vm607_vm15, %v591_v55, %v623_v35  ;;  %v255_v34 = vmul.f32 0.5, %v1783_v32  ;;  %vm608_vm1 = vcmp.ge.f32.partialorder %v1784_v45, 0.0 }
 0x14e   :  { %1011 = vmatmul.mubr.f32.gmra.mrb[4].mxu1 %v668_v51  ;;  %v655_v9 = vadd.f32 1.0, %v639_v5  ;;  %v624_v63 = vsub.f32 0.0, %v592_v37  ;;  %v670_v44 = vmul.f32 %v654_v13, %v254_v4  ;;  %v256_v50 = vmul.f32 0.5, %v1785_v54 }
 0x14f   :  { %1013 = vmatprep.mubr.f32.mxu1 %v669_v1 }
 0x150   :  { %v671_v16 = vmul.f32 %v655_v9, %v255_v34  ;;  %v640_v62 = vsel %vm608_vm1, %v592_v37, %v624_v63 }
 0x151   :  { %v656_v24 = vadd.f32 1.0, %v640_v62 }
 0x152   :  { %1014 = vmatmul.mubr.f32.gmra.mrb[6].mxu1 %v670_v44 }
 0x153   :  { %1016 = vmatprep.mubr.f32.mxu1 %v671_v16  ;;  %v672_v0 = vmul.f32 %v656_v24, %v256_v50 }
 0x156   :  { %1017 = vmatmul.mubr.f32.gmra.mrb[8].mxu1 %v672_v0 }
 0x1ff   :  { %v997_v33 = vpop.f32.mrb[16].mxu0 }
 0x200   :  { %v768_v12 = vadd.f32 %v997_v33, %v878_v57  ;;  %v762_v59 = vpop.f32.mrb[17].mxu0 }
 0x201   :  { %v763_v31 = vadd.f32 %v878_v57, %v762_v59 }
 0x202   :  { %842 = vst.msk [vmem:[%s1737_s5 + $0x8] sm:$0xff] %vm47_vm0, %v768_v12 }
 0x203   :  { %841 = vst.msk [vmem:[%s1737_s5] sm:$0xff] %vm47_vm0, %v763_v31  ;;  %v1000_v49 = vpop.f32.mrb[18].mxu0 }
 0x204   :  { %v778_v43 = vadd.f32 %v1000_v49, %v878_v57  ;;  %v772_v48 = vpop.f32.mrb[19].mxu0 }
 0x205   :  { %v773_v58 = vadd.f32 %v878_v57, %v772_v48 }
 0x206   :  { %844 = vst.msk [vmem:[%s1737_s5 + $0x18] sm:$0xff] %vm47_vm0, %v778_v43 }
 0x207   :  { %843 = vst.msk [vmem:[%s1737_s5 + $0x10] sm:$0xff] %vm47_vm0, %v773_v58  ;;  %v1003_v52 = vpop.f32.mrb[20].mxu0 }
 0x208   :  { %v788_v22 = vadd.f32 %v1003_v52, %v878_v57  ;;  %v782_v21 = vpop.f32.mrb[21].mxu0 }
 0x209   :  { %v783_v20 = vadd.f32 %v878_v57, %v782_v21 }
 0x20a   :  { %v1006_v6 = vpop.f32.mrb[0].mxu1  ;;  %846 = vst.msk [vmem:[%s1737_s5 + $0x28] sm:$0xff] %vm47_vm0, %v788_v22 }
 0x20b   :  { %v798_v11 = vadd.f32 %v1006_v6, %v878_v57  ;;  %v792_v14 = vpop.f32.mrb[1].mxu1  ;;  %845 = vst.msk [vmem:[%s1737_s5 + $0x20] sm:$0xff] %vm47_vm0, %v783_v20 }
 0x20c   :  { %v793_v26 = vadd.f32 %v878_v57, %v792_v14 }
 0x20d   :  { %848 = vst.msk [vmem:[%s1737_s5 + $0x38] sm:$0xff] %vm47_vm0, %v798_v11 }
 0x20e   :  { %847 = vst.msk [vmem:[%s1737_s5 + $0x30] sm:$0xff] %vm47_vm0, %v793_v26 }
 0x21d   :  { %v1009_v61 = vpop.f32.mrb[2].mxu1 }
 0x21e   :  { %v808_v36 = vadd.f32 %v1009_v61, %v878_v57  ;;  %v802_v29 = vpop.f32.mrb[3].mxu1 }
 0x21f   :  { %v803_v41 = vadd.f32 %v878_v57, %v802_v29 }
 0x220   :  { %850 = vst.msk [vmem:[%s1737_s5 + $0x48] sm:$0xff] %vm47_vm0, %v808_v36 }
 0x221   :  { %849 = vst.msk [vmem:[%s1737_s5 + $0x40] sm:$0xff] %vm47_vm0, %v803_v41  ;;  %v1012_v7 = vpop.f32.mrb[4].mxu1 }
 0x222   :  { %v818_v25 = vadd.f32 %v1012_v7, %v878_v57  ;;  %v812_v53 = vpop.f32.mrb[5].mxu1 }
 0x223   :  { %v813_v2 = vadd.f32 %v878_v57, %v812_v53 }
 0x224   :  { %852 = vst.msk [vmem:[%s1737_s5 + $0x58] sm:$0xff] %vm47_vm0, %v818_v25 }
 0x225   :  { %851 = vst.msk [vmem:[%s1737_s5 + $0x50] sm:$0xff] %vm47_vm0, %v813_v2  ;;  %v1015_v28 = vpop.f32.mrb[6].mxu1 }
 0x226   :  { %v828_v60 = vadd.f32 %v1015_v28, %v878_v57  ;;  %v822_v23 = vpop.f32.mrb[7].mxu1 }
 0x227   :  { %v823_v3 = vadd.f32 %v878_v57, %v822_v23 }
 0x228   :  { %854 = vst.msk [vmem:[%s1737_s5 + $0x68] sm:$0xff] %vm47_vm0, %v828_v60 }
 0x229   :  { %853 = vst.msk [vmem:[%s1737_s5 + $0x60] sm:$0xff] %vm47_vm0, %v823_v3  ;;  %v1018_v40 = vpop.f32.mrb[8].mxu1 }
 0x22a   :  { %v838_v18 = vadd.f32 %v1018_v40, %v878_v57  ;;  %v832_v27 = vpop.f32.mrb[9].mxu1 }
 0x22b   :  { %v833_v55 = vadd.f32 %v878_v57, %v832_v27 }
 0x22c   :  { %856 = vst.msk [vmem:[%s1737_s5 + $0x78] sm:$0xff] %vm47_vm0, %v838_v18 }
 0x22d   :  { %855 = vst.msk [vmem:[%s1737_s5 + $0x70] sm:$0xff] %vm47_vm0, %v833_v55 }

</bundles_post_ra>
